<compile_context>
chip_gen: v7x
topology: tpu7x:2x2x1
jax: 0.10.0
libtpu: 0.0.40
codegen_flags: <defaults>
</compile_context>

<pallas_src>
import jax
import jax.numpy as jnp
from jax.experimental import pallas as pl
from jax.experimental.pallas import tpu as pltpu

LN_EPS = 1e-5


def _round_up(x, m):
    return ((x + m - 1) // m) * m


def _patch_expand_kernel(x_ref, w_ref, bias_ref, o_ref):
    # x_ref:    (TM, C)  token tile (input dtype)
    # w_ref:    (C, D)   gamma-folded projection weight, bf16 (grid-invariant)
    # bias_ref: (1, D)   beta-folded projection bias, f32   (grid-invariant)
    # o_ref:    (TM, D)
    x = x_ref[...].astype(jnp.float32)                 # LN statistics in f32 (VPU)
    mu = jnp.mean(x, axis=-1, keepdims=True)
    xc = x - mu
    var = jnp.mean(xc * xc, axis=-1, keepdims=True)
    xn = xc * jax.lax.rsqrt(var + LN_EPS)              # LN affine folded into w/bias
    y = jnp.dot(xn.astype(w_ref.dtype), w_ref[...],    # native bf16 MXU operands
                preferred_element_type=jnp.float32)    # f32 accumulation
    o_ref[...] = (y + bias_ref[...]).astype(o_ref.dtype)


def patch_expansion(x, gamma, beta, weight, bias, patch_size, img_size_in,
                    out_chans, *, tm=1024, matmul_dtype=jnp.bfloat16):
    """x: (B, N, C) tokens.  weight: (C, O, ph, pw) (ConvTranspose2d layout).
    bias: (O,).  Returns (B, O, H*ph, W*pw) NCHW, matching the PyTorch module."""
    B, N, C = x.shape
    ph, pw = patch_size
    H = img_size_in[0] // ph
    W = img_size_in[1] // pw
    assert N == H * W, f"token count {N} inconsistent with img_size_in/patch_size"
    O = out_chans
    D = O * ph * pw
    M = B * N

    io_bytes = jnp.dtype(x.dtype).itemsize
    w_bytes = jnp.dtype(matmul_dtype).itemsize
    # sublane packing of the I/O dtype: f32 -> 8, bf16 -> 16, int8 -> 32
    sub = max(8, 32 // io_bytes)

    # --- per-generation VMEM budget & token-tile selection ---------------------
    try:
        info = pltpu.get_tpu_info()
        vmem_cap = int(getattr(info, "vmem_capacity_bytes", 64 * 1024 * 1024))
    except Exception:  # pragma: no cover - conservative fallback (v7x per-TC)
        vmem_cap = 64 * 1024 * 1024
    budget = int(0.80 * vmem_cap)          # headroom for Mosaic internal scratch

    def vmem_bytes(t):
        return (2 * t * C * io_bytes       # double-buffered token tile
                + 2 * t * D * io_bytes     # double-buffered output tile
                + C * D * w_bytes          # single-buffered folded weight
                + D * 4                    # folded bias
                + 3 * t * C * 4            # in-kernel f32 temps: x_f32, xc, xn
                + t * D * 4)               # f32 matmul result before cast

    tm_eff = max(sub, min(tm, _round_up(M, sub)))     # don't over-pad tiny M
    tm_eff = _round_up(tm_eff, sub)
    while tm_eff > sub and vmem_bytes(tm_eff) > budget:
        tm_eff = max(sub, _round_up(tm_eff // 2, sub))
    # v7x megacore: make sure the ("parallel",) token axis yields >= 2 tiles.
    if M > sub and _round_up(M, tm_eff) // tm_eff < 2:
        tm_eff = _round_up((M + 1) // 2, sub)
    Mp = _round_up(M, tm_eff)

    vmem_limit = int(min(max(int(1.5 * vmem_bytes(tm_eff)), 32 * 1024 * 1024),
                         budget))

    # --- operands: LN affine folded into the projection (done ONCE here) -------
    w_f32 = weight.reshape(C, D).astype(jnp.float32)          # cols = o*ph*pw+i*pw+j
    w_fold = (gamma.astype(jnp.float32)[:, None] * w_f32).astype(matmul_dtype)
    bias_full = jnp.repeat(bias.astype(jnp.float32), ph * pw)  # (D,) per-col bias
    bias_fold = (beta.astype(jnp.float32) @ w_f32 + bias_full).reshape(1, D)

    x2d = x.reshape(M, C)
    if Mp != M:
        # Zero-padded rows: LN gives var=0 -> rsqrt(eps) finite (no NaN); the
        # garbage rows are sliced off below.  Do NOT remove the [:M] slice.
        x2d = jnp.pad(x2d, ((0, Mp - M), (0, 0)))

    cost = pl.CostEstimate(
        flops=2 * M * C * D,
        transcendentals=0,
        bytes_accessed=M * C * io_bytes + M * D * io_bytes + C * D * w_bytes + D * 4)

    invariant = pl.Buffered(1)   # grid-invariant blocks: no double buffering

    y2d = pl.pallas_call(
        _patch_expand_kernel,
        out_shape=jax.ShapeDtypeStruct((Mp, D), x.dtype),
        grid=(Mp // tm_eff,),
        in_specs=[
            pl.BlockSpec((tm_eff, C), lambda i: (i, 0)),                        # tokens
            pl.BlockSpec((C, D), lambda i: (0, 0), pipeline_mode=invariant),    # weight
            pl.BlockSpec((1, D), lambda i: (0, 0), pipeline_mode=invariant),    # bias
        ],
        out_specs=pl.BlockSpec((tm_eff, D), lambda i: (i, 0)),
        compiler_params=pltpu.CompilerParams(
            dimension_semantics=("parallel",),     # token axis sharded across TCs
            vmem_limit_bytes=vmem_limit),
        cost_estimate=cost,
    )(x2d, w_fold, bias_fold)

    # strip token padding, then layout glue to NCHW
    y2d = y2d[:M]
    y = y2d.reshape(B, H, W, O, ph, pw)
    # TODO(synk): the NCHW transpose below is one extra HBM read+write of the whole
    # output done by XLA; producing NCHW directly in-kernel would require a
    # token<->patch-axis interleave (a transpose) at lane width pw, which is a poor
    # TPU layout — if the consumer accepts the patch layout (B, H, W, O, ph, pw),
    # return `y` here instead and skip the transpose.
    y = jnp.transpose(y, (0, 3, 1, 4, 2, 5))
    return y.reshape(B, O, H * ph, W * pw)


def _reference(x, gamma, beta, weight, bias, patch_size, img_size_in, out_chans):
    # pure-JAX f32 reference of the PyTorch forward
    B, N, C = x.shape
    ph, pw = patch_size
    H = img_size_in[0] // ph
    W = img_size_in[1] // pw
    mu = jnp.mean(x, axis=-1, keepdims=True)
    var = jnp.mean((x - mu) ** 2, axis=-1, keepdims=True)
    xn = (x - mu) / jnp.sqrt(var + LN_EPS) * gamma + beta
    xi = xn.reshape(B, H, W, C)
    y = jnp.einsum('bhwc,coij->bohiwj', xi, weight) + bias[None, :, None, None, None, None]
    return y.reshape(B, out_chans, H * ph, W * pw)


def _run_case(key, B, embed_dim, patch_size, out_chans, img_size_in):
    H = img_size_in[0] // patch_size[0]
    W = img_size_in[1] // patch_size[1]
    N = H * W
    kx, kw, kb, kg, kbt = jax.random.split(key, 5)
    x = jax.random.normal(kx, (B, N, embed_dim), dtype=jnp.float32)
    # ConvTranspose2d weight shape: (in_channels, out_channels, kh, kw)
    weight = 0.1 * jax.random.normal(
        kw, (embed_dim, out_chans, patch_size[0], patch_size[1]), dtype=jnp.float32)
    bias = 0.1 * jax.random.normal(kb, (out_chans,), dtype=jnp.float32)
    gamma = 1.0 + 0.01 * jax.random.normal(kg, (embed_dim,), dtype=jnp.float32)
    beta = 0.01 * jax.random.normal(kbt, (embed_dim,), dtype=jnp.float32)

    out = patch_expansion(x, gamma, beta, weight, bias,
                          patch_size, img_size_in, out_chans)
    out = jax.block_until_ready(out)

    ref = _reference(x, gamma, beta, weight, bias,
                     patch_size, img_size_in, out_chans)
    assert out.shape == (B, out_chans, img_size_in[0], img_size_in[1]), out.shape
    # bf16 MXU operands (f32 accumulation, gamma folded into bf16 W) -> small drift.
    err = jnp.max(jnp.abs(out - ref))
    assert jnp.allclose(out, ref, atol=5e-2, rtol=5e-2), f"max abs err {err}"


if __name__ == "__main__":
    key = jax.random.PRNGKey(0)
    k1, k2 = jax.random.split(key)
    # small single-ish case: B=2, N=16 tokens, C=32, D=16
    _run_case(k1, B=2, embed_dim=32, patch_size=(2, 2), out_chans=4,
              img_size_in=(8, 8))
    # multi-tile case exercising M-padding and D not a multiple of 128:
    # B=3, N=49 tokens (M=147 -> padded), C=48, D=24
    _run_case(k2, B=3, embed_dim=48, patch_size=(2, 2), out_chans=6,
              img_size_in=(14, 14))
    print("KERNEL_OK")
</pallas_src>

<mosaic_0001>
module attributes {stable_mosaic.version = 11 : i64} {
  func.func @_patch_expand_kernel(%arg0: i32, %arg1: memref<16x32xf32, #tpu.memory_space<vmem>>, %arg2: memref<32x16xbf16, #tpu.memory_space<vmem>>, %arg3: memref<1x16xf32, #tpu.memory_space<vmem>>, %arg4: memref<16x16xf32, #tpu.memory_space<vmem>>) attributes {dimension_semantics = [#tpu.dimension_semantics<parallel>], iteration_bounds = array<i64: 2>, scalar_prefetch = 0 : i64, scratch_operands = 0 : i64, tpu.core_type = #tpu.core_type<tc>, window_params = [{transform_indices = @transform_0, window_bounds = array<i64: 16, 32>}, {pipeline_mode = #tpu.pipeline_mode<synchronous>, transform_indices = @transform_1, window_bounds = array<i64: 32, 16>}, {pipeline_mode = #tpu.pipeline_mode<synchronous>, transform_indices = @transform_2, window_bounds = array<i64: 1, 16>}, {transform_indices = @transform_3, window_bounds = array<i64: 16, 16>}]} {
    %c0 = arith.constant 0 : index
    %c0_0 = arith.constant 0 : index
    %0 = vector.load %arg1[%c0, %c0_0] : memref<16x32xf32, #tpu.memory_space<vmem>>, vector<16x32xf32>
    %cst = arith.constant dense<0.000000e+00> : vector<16xf32>
    %1 = vector.multi_reduction <add>, %0, %cst [1] : vector<16x32xf32> to vector<16xf32>
    %2 = vector.shape_cast %1 : vector<16xf32> to vector<16x1xf32>
    %cst_1 = arith.constant 3.200000e+01 : f32
    %3 = vector.broadcast %cst_1 : f32 to vector<16x1xf32>
    %4 = arith.divf %2, %3 : vector<16x1xf32>
    %5 = vector.broadcast %4 : vector<16x1xf32> to vector<16x32xf32>
    %6 = arith.subf %0, %5 : vector<16x32xf32>
    %7 = arith.mulf %6, %6 : vector<16x32xf32>
    %cst_2 = arith.constant dense<0.000000e+00> : vector<16xf32>
    %8 = vector.multi_reduction <add>, %7, %cst_2 [1] : vector<16x32xf32> to vector<16xf32>
    %9 = vector.shape_cast %8 : vector<16xf32> to vector<16x1xf32>
    %cst_3 = arith.constant 3.200000e+01 : f32
    %10 = vector.broadcast %cst_3 : f32 to vector<16x1xf32>
    %11 = arith.divf %9, %10 : vector<16x1xf32>
    %cst_4 = arith.constant 9.99999974E-6 : f32
    %12 = vector.broadcast %cst_4 : f32 to vector<16x1xf32>
    %13 = arith.addf %11, %12 : vector<16x1xf32>
    %14 = math.rsqrt %13 : vector<16x1xf32>
    %15 = vector.broadcast %14 : vector<16x1xf32> to vector<16x32xf32>
    %16 = arith.mulf %6, %15 : vector<16x32xf32>
    %17 = arith.truncf %16 : vector<16x32xf32> to vector<16x32xbf16>
    %c0_5 = arith.constant 0 : index
    %c0_6 = arith.constant 0 : index
    %18 = vector.load %arg2[%c0_5, %c0_6] : memref<32x16xbf16, #tpu.memory_space<vmem>>, vector<32x16xbf16>
    %cst_7 = arith.constant dense<0.000000e+00> : vector<16x16xf32>
    %19 = tpu.matmul %17, %18, %cst_7 {dimension_numbers = #tpu.dot_dimension_numbers<[1], [0], [0], [1], [0, 0, 1, 1], [], []>} : vector<16x32xbf16>, vector<32x16xbf16>, vector<16x16xf32> -> vector<16x16xf32>
    %c0_8 = arith.constant 0 : index
    %c0_9 = arith.constant 0 : index
    %20 = vector.load %arg3[%c0_8, %c0_9] : memref<1x16xf32, #tpu.memory_space<vmem>>, vector<1x16xf32>
    %21 = vector.broadcast %20 : vector<1x16xf32> to vector<16x16xf32>
    %22 = arith.addf %19, %21 : vector<16x16xf32>
    %c0_10 = arith.constant 0 : index
    %c0_11 = arith.constant 0 : index
    %23 = vector.load %arg4[%c0_10, %c0_11] : memref<16x16xf32, #tpu.memory_space<vmem>>, vector<16x16xf32>
    tpu.vector_store %arg4[%c0_10, %c0_11], %22 {strides = array<i32>} : memref<16x16xf32, #tpu.memory_space<vmem>>, vector<16x16xf32>,
    return
  }
  func.func @transform_0(%arg0: i32) -> (i32, i32) {
    %c0_i32 = arith.constant 0 : i32
    %c0_i32_0 = arith.constant 0 : i32
    return %arg0, %c0_i32 : i32, i32
  }
  func.func @transform_1(%arg0: i32) -> (i32, i32) {
    %c0_i32 = arith.constant 0 : i32
    %c0_i32_0 = arith.constant 0 : i32
    %c0_i32_1 = arith.constant 0 : i32
    return %c0_i32, %c0_i32_0 : i32, i32
  }
  func.func @transform_2(%arg0: i32) -> (i32, i32) {
    %c0_i32 = arith.constant 0 : i32
    %c0_i32_0 = arith.constant 0 : i32
    %c0_i32_1 = arith.constant 0 : i32
    return %c0_i32, %c0_i32_0 : i32, i32
  }
  func.func @transform_3(%arg0: i32) -> (i32, i32) {
    %c0_i32 = arith.constant 0 : i32
    %c0_i32_0 = arith.constant 0 : i32
    return %arg0, %c0_i32 : i32, i32
  }
}

</mosaic_0001>

<bundles_post_ra>
// kernel: tpu_custom_call.1
= control target key start
LH: loop header
LB: loop body
LE: loop exit
PB: predicated region body
PF: predicated region fallthrough
CT: control target
= control target key end

     0   :  { %8 = vsyncpa [#allocation3], 0  ;;  %s652_s0 = inlined_call_operand.hbm [shape: f32[32,32], index: 0, kind: input, shape index: {}]   ;;  %s653_s1 = inlined_call_operand.vmem [shape: bf16[32,16], index: 1, kind: input, shape index: {}]   ;;  %s654_s2 = inlined_call_operand.vmem [shape: f32[1,16], index: 2, kind: input, shape index: {}]   ;;  %s655_s3 = inlined_call_operand.vmem [shape: f32[32,16], index: 3, kind: output, shape index: {}]  }
   0x1   :  { %10 = vsyncpa [#allocation3 + $0x1], 0  ;;  %s531_s12 = smov 0   ;;  %s533_s13 = smov 0  }
   0x2   :  { %s535_s14 = smov 0   ;;  %s537_s15 = smov 0  }
   0x3 LB: > { %s362_s16 = sadd.s32 4294967295, %s504_s15   ;;  %s551_s17 = sadd.s32 1, %s504_s15   ;;  %s504_s15 = sphi %s537_s15, %s662_s15   ;;  %s500_s14 = sphi %s535_s14, %s661_s14   ;;  %s496_s13 = sphi %s533_s13, %s660_s13   ;;  %s492_s12 = sphi %s531_s12, %s659_s12  }
   0x4   : > { %s20_s18 = ssub.s32 %s504_s15, %s551_s17  ;;  %s23_s19 = sadd.s32 1, %s500_s14 }
   0x5   : > { %p21_p0 = scmp.eq.s32.totalorder %s20_s18, 0  ;;  %p30_p1 = scmp.ne.s32.totalorder %s500_s14, %s496_s13 }
   0x6   : > { %p31_p2 = scmp.eq.s32.totalorder %s504_s15, 0  ;;  %p36_p3 = scmp.ne.s32.totalorder %s496_s13, %s492_s12 }
   0x7   : > { %s561_s20 = scalar_select %p21_p0, %s500_s14, %s23_s19  }
   0x8   : > { %p32_p4 = por %p31_p2, %p30_p1  ;;  %p37_p5 = scmp.eq.s32.totalorder %s362_s16, 0 }
   0x9   : > { %p397_p6 = scmp.lt.s32.totalorder %s504_s15, 2  ;;  %s134_s22 = sand.u32 1, %s500_s14  }
   0xa   : > { %p566_p7 = por %p37_p5, %p36_p3  ;;  %s366_s23 = sshll.u32 %s134_s22, 4 }
   0xb   : > { %s379_s24 = sshll.u32 %s504_s15, 8  ;;  %s138_s28 = scalar_lea.vmem [#allocation2], %s366_s23 }
   0xc   : > { %s575_s27 = scalar_lea.hbm %s652_s0, %s379_s24  ;;  %s145_s29 = sshll.u32 %s138_s28, 4  ;;  %s577_s29 = int_to_ptr.vmem [resolvable:$true] %s145_s29 }
   0xd   : > { %p579_p8 = pnand %p397_p6, %p32_p4  ;;  %s584_s4 = scalar_lea.sflag [#allocation3], %s134_s22 }
   0xe   : > { %s440_s5 = scalar_lea.hbm %s575_s27, 256  ;;  %s445_s8 = scalar_lea.hbm %s652_s0, 512 }
   0xf   : > { %p441_p10 = scmp.ne.s32.totalorder %s575_s27, %s440_s5  ;;  %p442_p11 = pneg %p579_p8 }
  0x10   : > { %p446_p0 = scmp.lt.u32.totalorder %s575_s27, %s652_s0  ;;  %p447_p1 = scmp.lt.u32.totalorder %s445_s8, %s440_s5 }
  0x11   : > { %p443_p12 = pnand %p442_p11, %p441_p10  ;;  %p449_p3 = scmp.lt.u32.totalorder %s440_s5, %s575_s27 }
  0x12   : > { %p448_p2 = por %p447_p1, %p446_p0 }
  0x13   : > { %p444_p13 = pneg %p443_p12 }
  0x14   : > { %p450_p4 = por %p449_p3, %p448_p2 }
  0x16   : > { %p451_p5 = pnand %p450_p4, %p444_p13 }
  0x18   : > { %454 = shalt.err (!%p451_p5)
}
  0x19   : > { %s455_s11 = scalar_lea.vmem %s577_s29, 256  ;;  %s506_s12 = smov [#allocation2]  }
  0x1a   : > { %p456_p6 = scmp.ne.s32.totalorder %s577_s29, %s455_s11  ;;  %s460_s18 = sshll.u32 %s506_s12, 4  ;;  %s461_s18 = int_to_ptr.vmem [resolvable:$false] %s460_s18 }
  0x1b   : > { %s462_s19 = scalar_lea.vmem %s461_s18, 512  ;;  %p463_p9 = scmp.lt.s32.totalorder %s577_s29, %s461_s18 }
  0x1c   : > { %p458_p10 = pnand %p456_p6, %p442_p11  ;;  %p464_p0 = scmp.lt.s32.totalorder %s462_s19, %s455_s11 }
  0x1e   : > { %p459_p12 = pneg %p458_p10  ;;  %p465_p1 = por %p464_p0, %p463_p9 }
  0x20   : > { %p466_p2 = pnand %p465_p1, %p459_p12 }
  0x22   : > { %469 = shalt.err (!%p466_p2)
}
  0x23   : > { %s507_s22 = smov 128   ;;  %s508_s23 = smov 8  }
  0x24   : > { %396 = dma.hbm_to_vmem [thread:$0]  (!%p579_p8), %s575_s27, 256, %s577_s29, %s584_s4, %s507_s22, %s507_s22, %s508_s23  }
  0x25   : > { %p153_p11 = scmp.lt.s32.totalorder %s504_s15, 3  ;;  %p658_p13 = scmp.ge.s32.totalorder %s504_s15, 1 }
  0x27   : > { %p154_p3 = pnand %p658_p13, %p153_p11 }
  0x28   : > { %s159_s24 = sand.u32 (!%p154_p3), 1, %s496_s13  }
  0x29   : > { %157 = sbr.rel (%p154_p3) target bundleno = 582 (0x246), region = 32  ;;  %s370_s25 = sshll.u32 (!%p154_p3), %s159_s24, 4 }
  0x2a   : > { %s160_s26 = scalar_lea.sflag (!%p154_p3), [#allocation3], %s159_s24  ;;  %s163_s28 = scalar_lea.vmem (!%p154_p3), [#allocation2], %s370_s25 }
  0x30   : > { %487 = dma.done.wait (%p566_p7), %s160_s26, 256  }
  0x31   : > { %489 = vsyncadd (%p566_p7), %s160_s26, 4294967040  ;;  %vm196_vm0 = vcmask 261120   ;;  %v194_v0 = vld [vmem:[%s163_s28] sm:$0xff]  ;;  %v195_v1 = vld [vmem:[%s163_s28 + $0x8] sm:$0xff]  ;;  %v509_v15 = vmov 0.0   ;;  %vm510_vm1 = vmmov 0  }
  0x32   : > { %v197_v2 = vsel %vm196_vm0, %v194_v0, 0.0  ;;  %v200_v3 = vsel %vm196_vm0, %v195_v1, 0.0  ;;  %v434_v14 = vld [vmem:[%s653_s1] sm:$0xff]   ;;  %383 = vmatprep.subr.bf16.mxu0 %v509_v15  ;;  %387 = vmatprep.mubr.msk.bf16.mxu0 %vm510_vm1, %v509_v15  ;;  %v435_v16 = vld [vmem:[%s653_s1 + $0x8] sm:$0xff]   ;;  %s371_s4 = sshll.u32 %s362_s16, 1  ;;  %vm292_vm2 = vcmask 130048  }
  0x33   : > { %198 = vadd.xlane.f32.xlu0 %v197_v2  ;;  %384 = vmatpush3.bf16.msra.mxu0 %v434_v14  ;;  %p188_p7 = scmp.lt.s32.totalorder %s371_s4, 3  ;;  %v373_v28 = vld [vmem:[%s654_s2] ss:$0 sm:$0xff] }
  0x34   : > { %385 = vmatprep.subr.bf16.mxu0 %v509_v15 }
  0x35   : > { %s664_s4 = smov (!%p188_p7, %s371_s4), 3 }
  0x36   : > { %s372_s5 = sshll.u32 %s664_s4, 3 }
  0x37   : > { %201 = vadd.xlane.f32.xlu0 %v200_v3  ;;  %386 = vmatpush3.bf16.msra.mxu0 %v435_v16  ;;  %s191_s10 = scalar_lea.vmem %s655_s3, %s372_s5 }
  0xc0   : > { %v199_v4 = vpop.xlane.xlu0 %198 }
  0xc1   : > { %v204_v5 = vmul.f32 0.03125, %v199_v4 }
  0xc3   : > { %v206_v6 = vsub.f32 %v194_v0, %v204_v5 }
  0xc4   : > { %v202_v7 = vpop.xlane.xlu0 %201 }
  0xc5   : > { %v205_v8 = vmul.f32 0.03125, %v202_v7  ;;  %v208_v9 = vmul.f32 %v206_v6, %v206_v6 }
  0xc7   : > { %v207_v10 = vsub.f32 %v195_v1, %v205_v8  ;;  %v210_v11 = vsel %vm196_vm0, %v208_v9, 0.0 }
  0xc8   : > { %211 = vadd.xlane.f32.xlu1 %v210_v11 }
  0xc9   : > { %v209_v12 = vmul.f32 %v207_v10, %v207_v10 }
  0xcb   : > { %v213_v13 = vsel %vm196_vm0, %v209_v12, 0.0 }
  0xcc   : > { %214 = vadd.xlane.f32.xlu1 %v213_v13 }
 0x155   : > { %v212_v17 = vpop.xlane.xlu1 %211 }
 0x156   : > { %v216_v18 = vmul.f32 0.03125, %v212_v17 }
 0x158   : > { %v218_v19 = vadd.f32 1e-05, %v216_v18 }
 0x159   : > { %v215_v20 = vpop.xlane.xlu1 %214 }
 0x15a   : > { %v217_v21 = vmul.f32 0.03125, %v215_v20  ;;  %436 = vrsqrt.f32 %v218_v19 }
 0x15c   : > { %v219_v22 = vadd.f32 1e-05, %v217_v21 }
 0x15e   : > { %438 = vrsqrt.f32 %v219_v22 }
 0x164   : > { %v437_v23 = vpop.eup %436 }
 0x165   : > { %v222_v25 = vmul.f32 %v437_v23, %v206_v6 }
 0x168   : > { %v439_v24 = vpop.eup %438 }
 0x169   : > { %v223_v26 = vmul.f32 %v439_v24, %v207_v10 }
 0x16b   : > { %v224_v27 = vpack.c.bf16 %v223_v26, %v222_v25 }
 0x16d   : > { %388 = vmatmul.mubr.msk.bf16.vlgmr.msra.gmra.mrb[0].mxu0 %vm196_vm0, %v224_v27 }
 0x240   : > { %v285_v29 = vpop.f32.mrb[0].mxu0 }
 0x241   : > { %v286_v30 = vadd.f32 %v373_v28, %v285_v29  ;;  %v389_v31 = vpop.f32.mrb[1].mxu0 }
 0x242   : > { %v288_v32 = vpop.f32.mrb[2].mxu0 }
 0x243   : > { %293 = vst.msk [vmem:[%s191_s10] sm:$0xff] %vm292_vm2, %v286_v30  ;;  %v289_v33 = vadd.f32 %v373_v28, %v288_v32  ;;  %v390_v34 = vpop.f32.mrb[3].mxu0 }
 0x245   : > { %294 = vst.msk [vmem:[%s191_s10 + $0x8] sm:$0xff] %vm292_vm2, %v289_v33 }
 0x246 PF: > { %p13_p8 = scmp.ge.s32.totalorder %s551_s17, 4   ;;  %s659_s12 = smov %s496_s13 }
 0x247   : > { %s660_s13 = smov %s500_s14  ;;  %s661_s14 = smov %s561_s20 }
 0x248   : > { %s662_s15 = smov %s551_s17  ;;  %15 = sbr.rel (!%p13_p8) target bundleno = 3 (0x3), region = 72 }
 0x24f   :  { %317 = vsyncpa [#allocation3], 1 }
 0x250   :  { %319 = vsyncpa [#allocation3 + $0x1], 1 }

</bundles_post_ra>
